<compile_context>
chip_gen: v7x
topology: tpu7x:2x2x1
jax: 0.10.0
libtpu: 0.0.40
codegen_flags: <defaults>
</compile_context>

<pallas_src>
import jax
import jax.numpy as jnp
from jax.experimental import pallas as pl
from jax.experimental.pallas import tpu as pltpu


def _ss_mlp_kernel(idx_ref, rw_ref,                      # scalar-prefetch (SMEM)
                   hs_hbm, w1t_ref, w3t_ref, w2t_ref,    # inputs
                   o_ref,                                # output
                   x_ref, acc_ref, gather_sem):          # scratch
    """Fused expert MLP. Grid axis 0 = reduction over intermediate-size tiles."""
    k = pl.program_id(0)
    padded_b = x_ref.shape[0]

    @pl.when(k == 0)
    def _init():
        # Data-dependent row gather: hidden_states[input_idx[i]] -> x_ref[i].
        copies = []
        for i in range(padded_b):
            cp = pltpu.make_async_copy(
                hs_hbm.at[pl.ds(idx_ref[i], 1)],   # [1, H] row in HBM
                x_ref.at[pl.ds(i, 1)],             # [1, H] row in VMEM
                gather_sem.at[i],
            )
            cp.start()
            copies.append(cp)
        for cp in copies:
            cp.wait()
        acc_ref[...] = jnp.zeros_like(acc_ref)

    # Compute this intermediate tile: SiLU(x @ W1t) * (x @ W3t), then accumulate @ W2t.
    x = x_ref[...].astype(w1t_ref.dtype)                                   # [Bp, H] -> bf16
    h1 = jnp.dot(x, w1t_ref[...], preferred_element_type=jnp.float32)      # [Bp, tI]
    h3 = jnp.dot(x, w3t_ref[...], preferred_element_type=jnp.float32)      # [Bp, tI]
    inter = (h1 * jax.nn.sigmoid(h1)) * h3                                 # f32
    acc_ref[...] += jnp.dot(inter.astype(w2t_ref.dtype), w2t_ref[...],
                            preferred_element_type=jnp.float32)            # [Bp, H] f32 acc

    @pl.when(k == pl.num_programs(0) - 1)
    def _finalize():
        # SPDenseWeightedLinear: scale each token row by its routing weight
        # (f32 scalar from SMEM broadcast over a lane-dense [H] row).
        for i in range(padded_b):
            o_ref[i, :] = (acc_ref[i, :] * rw_ref[i]).astype(o_ref.dtype)


def ss_minicpm_mlp(hidden_states, input_idx, routing_weights, w1t, w3t, w2t, *, tile_i=512):
    """hidden_states: [T, H] float; input_idx: [B] int; routing_weights: [1, B] (or [B]);
    w1t, w3t: [H, I]; w2t: [I, H] -- pre-transposed ("Trans") weights cached at model init,
    ideally bf16.  Returns [B, H] in hidden_states.dtype."""
    batch_size = int(input_idx.shape[0])
    hidden = hidden_states.shape[-1]
    inter = w1t.shape[-1]
    assert w1t.shape == (hidden, inter)
    assert w3t.shape == (hidden, inter)
    assert w2t.shape == (inter, hidden)
    assert hidden % 128 == 0 and inter % 128 == 0

    # Pad the routed batch to the sublane packing width of the activation dtype.
    act_bytes = jnp.dtype(hidden_states.dtype).itemsize
    sublane = 8 if act_bytes >= 4 else 16
    padded_b = max(sublane, ((batch_size + sublane - 1) // sublane) * sublane)

    # Scalar-prefetch operands (SMEM): padded token indices (pad -> row 0, harmless,
    # sliced off) and padded routing weights (pad -> 0).
    idx = jnp.zeros((padded_b,), jnp.int32).at[:batch_size].set(input_idx.astype(jnp.int32))
    rw = jnp.zeros((padded_b,), jnp.float32).at[:batch_size].set(
        jnp.asarray(routing_weights).reshape(-1).astype(jnp.float32))

    w_bytes = jnp.dtype(w1t.dtype).itemsize
    out_bytes = act_bytes

    def _vmem_need(ti):
        weights = 3 * 2 * hidden * ti * w_bytes                          # double-buffered tiles
        resident = padded_b * hidden * (act_bytes + 4 + 2 * out_bytes)   # x + f32 acc + out
        return weights + resident

    # Largest intermediate-dim tile that (a) divides I, (b) is a multiple of 128,
    # (c) keeps double-buffered weight streaming under a budget that fits every
    # generation (incl. v7x's 64 MiB VMEM / core).
    budget = 48 * 1024 * 1024
    t = max(128, (min(tile_i, inter) // 128) * 128)
    while inter % t:
        t -= 128
    while t > 128 and _vmem_need(t) > budget:
        t -= 128
        while inter % t:
            t -= 128
    tile_i = t
    vmem_limit = int(min(max(_vmem_need(tile_i) + (8 << 20), 32 << 20), 56 << 20))

    n_k = inter // tile_i

    out = pl.pallas_call(
        _ss_mlp_kernel,
        out_shape=jax.ShapeDtypeStruct((padded_b, hidden), hidden_states.dtype),
        grid_spec=pltpu.PrefetchScalarGridSpec(
            num_scalar_prefetch=2,
            grid=(n_k,),
            in_specs=[
                pl.BlockSpec(memory_space=pl.ANY),                          # hidden_states (HBM)
                pl.BlockSpec((hidden, tile_i), lambda k, idx, rw: (0, k)),  # w1t tile
                pl.BlockSpec((hidden, tile_i), lambda k, idx, rw: (0, k)),  # w3t tile
                pl.BlockSpec((tile_i, hidden), lambda k, idx, rw: (k, 0)),  # w2t tile
            ],
            out_specs=pl.BlockSpec((padded_b, hidden), lambda k, idx, rw: (0, 0)),
            scratch_shapes=[
                pltpu.VMEM((padded_b, hidden), hidden_states.dtype),  # gathered x
                pltpu.VMEM((padded_b, hidden), jnp.float32),          # f32 accumulator
                pltpu.SemaphoreType.DMA((padded_b,)),                 # gather semaphores
            ],
        ),
        compiler_params=pltpu.CompilerParams(
            dimension_semantics=("arbitrary",),
            vmem_limit_bytes=vmem_limit,
        ),
    )(idx, rw, hidden_states, w1t, w3t, w2t)

    return out[0:batch_size, :]


def _reference(hidden_states, input_idx, routing_weights, w1, w3, w2):
    # Pure-JAX reference with PyTorch [out, in] weight layout.
    x = hidden_states[input_idx]
    inter = jax.nn.silu(x @ w1.T) * (x @ w3.T)
    return (inter @ w2.T) * routing_weights.T


if __name__ == "__main__":
    key = jax.random.PRNGKey(0)
    k_hs, k_w1, k_w3, k_w2, k_idx, k_rw = jax.random.split(key, 6)

    num_tokens = 16
    hidden_size = 128
    intermediate_size = 256
    batch_size = 6          # tokens routed to this expert (exercises the [0:batch] slice)

    hidden_states = jax.random.normal(k_hs, (num_tokens, hidden_size), jnp.float32) * 0.5
    # PyTorch nn.Linear layout [out_features, in_features]:
    w1 = jax.random.normal(k_w1, (intermediate_size, hidden_size), jnp.float32) * 0.05
    w3 = jax.random.normal(k_w3, (intermediate_size, hidden_size), jnp.float32) * 0.05
    w2 = jax.random.normal(k_w2, (hidden_size, intermediate_size), jnp.float32) * 0.05
    input_idx = jax.random.permutation(k_idx, num_tokens)[:batch_size].astype(jnp.int32)
    routing_weights = jax.nn.softmax(
        jax.random.normal(k_rw, (1, batch_size), jnp.float32), axis=-1)

    # One-time, init-style weight prep (cached; NOT part of the per-call forward path):
    # pre-transposed "Trans" layout [in, out] and bf16 for halved weight-streaming traffic.
    w1t = w1.T.astype(jnp.bfloat16)
    w3t = w3.T.astype(jnp.bfloat16)
    w2t = w2.T.astype(jnp.bfloat16)
    w1t, w3t, w2t = jax.block_until_ready((w1t, w3t, w2t))

    out = ss_minicpm_mlp(hidden_states, input_idx, routing_weights, w1t, w3t, w2t)
    out = jax.block_until_ready(out)

    # Reference uses the same bf16-quantized weight values (upcast to f32) so the
    # comparison isolates kernel structure; residual error is the bf16 activation cast.
    ref = _reference(hidden_states, input_idx, routing_weights,
                     w1t.astype(jnp.float32).T,
                     w3t.astype(jnp.float32).T,
                     w2t.astype(jnp.float32).T)

    assert out.shape == (batch_size, hidden_size)
    max_err = float(jnp.max(jnp.abs(out - ref)))
    assert jnp.allclose(out, ref, atol=2e-3, rtol=2e-2), f"mismatch vs reference, max_err={max_err}"
    print("KERNEL_OK")
</pallas_src>

<mosaic_0001>
module attributes {stable_mosaic.version = 11 : i64} {
  func.func @_ss_mlp_kernel(%arg0: i32, %arg1: memref<8xi32, #tpu.memory_space<smem>>, %arg2: memref<8xf32, #tpu.memory_space<smem>>, %arg3: memref<16x128xf32, #tpu.memory_space<any>>, %arg4: memref<128x256xbf16, #tpu.memory_space<vmem>>, %arg5: memref<128x256xbf16, #tpu.memory_space<vmem>>, %arg6: memref<256x128xbf16, #tpu.memory_space<vmem>>, %arg7: memref<8x128xf32, #tpu.memory_space<vmem>>, %arg8: memref<8x128xf32, #tpu.memory_space<vmem>>, %arg9: memref<8x128xf32, #tpu.memory_space<vmem>>, %arg10: memref<8x!tpu.dma_semaphore, #tpu.memory_space<semaphore_mem>>) attributes {dimension_semantics = [#tpu.dimension_semantics<arbitrary>], iteration_bounds = array<i64: 1>, scalar_prefetch = 2 : i64, scratch_operands = 3 : i64, tpu.core_type = #tpu.core_type<tc>, window_params = [{}, {transform_indices = @transform_1, window_bounds = array<i64: 128, 256>}, {transform_indices = @transform_2, window_bounds = array<i64: 128, 256>}, {transform_indices = @transform_3, window_bounds = array<i64: 256, 128>}, {pipeline_mode = #tpu.pipeline_mode<synchronous>, transform_indices = @transform_4, window_bounds = array<i64: 8, 128>}]} {
    %c0_i32 = arith.constant 0 : i32
    %0 = arith.cmpi eq, %arg0, %c0_i32 : i32
    %1 = arith.extui %0 : i1 to i32
    %c0_i32_0 = arith.constant 0 : i32
    %2 = arith.cmpi ne, %1, %c0_i32_0 : i32
    scf.if %2 {
      %c0_17 = arith.constant 0 : index
      %25 = memref.load %arg1[%c0_17] : memref<8xi32, #tpu.memory_space<smem>>
      %c0_i32_18 = arith.constant 0 : i32
      %c0_i32_19 = arith.constant 0 : i32
      %26 = tpu.memref_slice %arg3[%25, %c0_i32_19] : memref<16x128xf32, #tpu.memory_space<any>> -> memref<1x128xf32, #tpu.memory_space<any>>
      %c0_i32_20 = arith.constant 0 : i32
      %c0_i32_21 = arith.constant 0 : i32
      %27 = tpu.memref_slice %arg8[%c0_i32_20, %c0_i32_21] : memref<8x128xf32, #tpu.memory_space<vmem>> -> memref<1x128xf32, #tpu.memory_space<vmem>>
      %28 = tpu.memref_slice %arg10[%c0_i32_18] : memref<8x!tpu.dma_semaphore, #tpu.memory_space<semaphore_mem>> -> memref<1x!tpu.dma_semaphore, #tpu.memory_space<semaphore_mem>>
      %29 = tpu.memref_squeeze %28 : memref<1x!tpu.dma_semaphore, #tpu.memory_space<semaphore_mem>> -> memref<!tpu.dma_semaphore, #tpu.memory_space<semaphore_mem>>
      tpu.enqueue_dma source(%26 : memref<1x128xf32, #tpu.memory_space<any>>) target(%27 : memref<1x128xf32, #tpu.memory_space<vmem>>) target_semaphore(%29 : memref<!tpu.dma_semaphore, #tpu.memory_space<semaphore_mem>>)
      %c1 = arith.constant 1 : index
      %30 = memref.load %arg1[%c1] : memref<8xi32, #tpu.memory_space<smem>>
      %c1_i32 = arith.constant 1 : i32
      %c0_i32_22 = arith.constant 0 : i32
      %31 = tpu.memref_slice %arg3[%30, %c0_i32_22] : memref<16x128xf32, #tpu.memory_space<any>> -> memref<1x128xf32, #tpu.memory_space<any>>
      %c1_i32_23 = arith.constant 1 : i32
      %c0_i32_24 = arith.constant 0 : i32
      %32 = tpu.memref_slice %arg8[%c1_i32_23, %c0_i32_24] : memref<8x128xf32, #tpu.memory_space<vmem>> -> memref<1x128xf32, #tpu.memory_space<vmem>>
      %33 = tpu.memref_slice %arg10[%c1_i32] : memref<8x!tpu.dma_semaphore, #tpu.memory_space<semaphore_mem>> -> memref<1x!tpu.dma_semaphore, #tpu.memory_space<semaphore_mem>>
      %34 = tpu.memref_squeeze %33 : memref<1x!tpu.dma_semaphore, #tpu.memory_space<semaphore_mem>> -> memref<!tpu.dma_semaphore, #tpu.memory_space<semaphore_mem>>
      tpu.enqueue_dma source(%31 : memref<1x128xf32, #tpu.memory_space<any>>) target(%32 : memref<1x128xf32, #tpu.memory_space<vmem>>) target_semaphore(%34 : memref<!tpu.dma_semaphore, #tpu.memory_space<semaphore_mem>>)
      %c2 = arith.constant 2 : index
      %35 = memref.load %arg1[%c2] : memref<8xi32, #tpu.memory_space<smem>>
      %c2_i32 = arith.constant 2 : i32
      %c0_i32_25 = arith.constant 0 : i32
      %36 = tpu.memref_slice %arg3[%35, %c0_i32_25] : memref<16x128xf32, #tpu.memory_space<any>> -> memref<1x128xf32, #tpu.memory_space<any>>
      %c2_i32_26 = arith.constant 2 : i32
      %c0_i32_27 = arith.constant 0 : i32
      %37 = tpu.memref_slice %arg8[%c2_i32_26, %c0_i32_27] : memref<8x128xf32, #tpu.memory_space<vmem>> -> memref<1x128xf32, #tpu.memory_space<vmem>>
      %38 = tpu.memref_slice %arg10[%c2_i32] : memref<8x!tpu.dma_semaphore, #tpu.memory_space<semaphore_mem>> -> memref<1x!tpu.dma_semaphore, #tpu.memory_space<semaphore_mem>>
      %39 = tpu.memref_squeeze %38 : memref<1x!tpu.dma_semaphore, #tpu.memory_space<semaphore_mem>> -> memref<!tpu.dma_semaphore, #tpu.memory_space<semaphore_mem>>
      tpu.enqueue_dma source(%36 : memref<1x128xf32, #tpu.memory_space<any>>) target(%37 : memref<1x128xf32, #tpu.memory_space<vmem>>) target_semaphore(%39 : memref<!tpu.dma_semaphore, #tpu.memory_space<semaphore_mem>>)
      %c3 = arith.constant 3 : index
      %40 = memref.load %arg1[%c3] : memref<8xi32, #tpu.memory_space<smem>>
      %c3_i32 = arith.constant 3 : i32
      %c0_i32_28 = arith.constant 0 : i32
      %41 = tpu.memref_slice %arg3[%40, %c0_i32_28] : memref<16x128xf32, #tpu.memory_space<any>> -> memref<1x128xf32, #tpu.memory_space<any>>
      %c3_i32_29 = arith.constant 3 : i32
      %c0_i32_30 = arith.constant 0 : i32
      %42 = tpu.memref_slice %arg8[%c3_i32_29, %c0_i32_30] : memref<8x128xf32, #tpu.memory_space<vmem>> -> memref<1x128xf32, #tpu.memory_space<vmem>>
      %43 = tpu.memref_slice %arg10[%c3_i32] : memref<8x!tpu.dma_semaphore, #tpu.memory_space<semaphore_mem>> -> memref<1x!tpu.dma_semaphore, #tpu.memory_space<semaphore_mem>>
      %44 = tpu.memref_squeeze %43 : memref<1x!tpu.dma_semaphore, #tpu.memory_space<semaphore_mem>> -> memref<!tpu.dma_semaphore, #tpu.memory_space<semaphore_mem>>
      tpu.enqueue_dma source(%41 : memref<1x128xf32, #tpu.memory_space<any>>) target(%42 : memref<1x128xf32, #tpu.memory_space<vmem>>) target_semaphore(%44 : memref<!tpu.dma_semaphore, #tpu.memory_space<semaphore_mem>>)
      %c4 = arith.constant 4 : index
      %45 = memref.load %arg1[%c4] : memref<8xi32, #tpu.memory_space<smem>>
      %c4_i32 = arith.constant 4 : i32
      %c0_i32_31 = arith.constant 0 : i32
      %46 = tpu.memref_slice %arg3[%45, %c0_i32_31] : memref<16x128xf32, #tpu.memory_space<any>> -> memref<1x128xf32, #tpu.memory_space<any>>
      %c4_i32_32 = arith.constant 4 : i32
      %c0_i32_33 = arith.constant 0 : i32
      %47 = tpu.memref_slice %arg8[%c4_i32_32, %c0_i32_33] : memref<8x128xf32, #tpu.memory_space<vmem>> -> memref<1x128xf32, #tpu.memory_space<vmem>>
      %48 = tpu.memref_slice %arg10[%c4_i32] : memref<8x!tpu.dma_semaphore, #tpu.memory_space<semaphore_mem>> -> memref<1x!tpu.dma_semaphore, #tpu.memory_space<semaphore_mem>>
      %49 = tpu.memref_squeeze %48 : memref<1x!tpu.dma_semaphore, #tpu.memory_space<semaphore_mem>> -> memref<!tpu.dma_semaphore, #tpu.memory_space<semaphore_mem>>
      tpu.enqueue_dma source(%46 : memref<1x128xf32, #tpu.memory_space<any>>) target(%47 : memref<1x128xf32, #tpu.memory_space<vmem>>) target_semaphore(%49 : memref<!tpu.dma_semaphore, #tpu.memory_space<semaphore_mem>>)
      %c5 = arith.constant 5 : index
      %50 = memref.load %arg1[%c5] : memref<8xi32, #tpu.memory_space<smem>>
      %c5_i32 = arith.constant 5 : i32
      %c0_i32_34 = arith.constant 0 : i32
      %51 = tpu.memref_slice %arg3[%50, %c0_i32_34] : memref<16x128xf32, #tpu.memory_space<any>> -> memref<1x128xf32, #tpu.memory_space<any>>
      %c5_i32_35 = arith.constant 5 : i32
      %c0_i32_36 = arith.constant 0 : i32
      %52 = tpu.memref_slice %arg8[%c5_i32_35, %c0_i32_36] : memref<8x128xf32, #tpu.memory_space<vmem>> -> memref<1x128xf32, #tpu.memory_space<vmem>>
      %53 = tpu.memref_slice %arg10[%c5_i32] : memref<8x!tpu.dma_semaphore, #tpu.memory_space<semaphore_mem>> -> memref<1x!tpu.dma_semaphore, #tpu.memory_space<semaphore_mem>>
      %54 = tpu.memref_squeeze %53 : memref<1x!tpu.dma_semaphore, #tpu.memory_space<semaphore_mem>> -> memref<!tpu.dma_semaphore, #tpu.memory_space<semaphore_mem>>
      tpu.enqueue_dma source(%51 : memref<1x128xf32, #tpu.memory_space<any>>) target(%52 : memref<1x128xf32, #tpu.memory_space<vmem>>) target_semaphore(%54 : memref<!tpu.dma_semaphore, #tpu.memory_space<semaphore_mem>>)
      %c6 = arith.constant 6 : index
      %55 = memref.load %arg1[%c6] : memref<8xi32, #tpu.memory_space<smem>>
      %c6_i32 = arith.constant 6 : i32
      %c0_i32_37 = arith.constant 0 : i32
      %56 = tpu.memref_slice %arg3[%55, %c0_i32_37] : memref<16x128xf32, #tpu.memory_space<any>> -> memref<1x128xf32, #tpu.memory_space<any>>
      %c6_i32_38 = arith.constant 6 : i32
      %c0_i32_39 = arith.constant 0 : i32
      %57 = tpu.memref_slice %arg8[%c6_i32_38, %c0_i32_39] : memref<8x128xf32, #tpu.memory_space<vmem>> -> memref<1x128xf32, #tpu.memory_space<vmem>>
      %58 = tpu.memref_slice %arg10[%c6_i32] : memref<8x!tpu.dma_semaphore, #tpu.memory_space<semaphore_mem>> -> memref<1x!tpu.dma_semaphore, #tpu.memory_space<semaphore_mem>>
      %59 = tpu.memref_squeeze %58 : memref<1x!tpu.dma_semaphore, #tpu.memory_space<semaphore_mem>> -> memref<!tpu.dma_semaphore, #tpu.memory_space<semaphore_mem>>
      tpu.enqueue_dma source(%56 : memref<1x128xf32, #tpu.memory_space<any>>) target(%57 : memref<1x128xf32, #tpu.memory_space<vmem>>) target_semaphore(%59 : memref<!tpu.dma_semaphore, #tpu.memory_space<semaphore_mem>>)
      %c7 = arith.constant 7 : index
      %60 = memref.load %arg1[%c7] : memref<8xi32, #tpu.memory_space<smem>>
      %c7_i32 = arith.constant 7 : i32
      %c0_i32_40 = arith.constant 0 : i32
      %61 = tpu.memref_slice %arg3[%60, %c0_i32_40] : memref<16x128xf32, #tpu.memory_space<any>> -> memref<1x128xf32, #tpu.memory_space<any>>
      %c7_i32_41 = arith.constant 7 : i32
      %c0_i32_42 = arith.constant 0 : i32
      %62 = tpu.memref_slice %arg8[%c7_i32_41, %c0_i32_42] : memref<8x128xf32, #tpu.memory_space<vmem>> -> memref<1x128xf32, #tpu.memory_space<vmem>>
      %63 = tpu.memref_slice %arg10[%c7_i32] : memref<8x!tpu.dma_semaphore, #tpu.memory_space<semaphore_mem>> -> memref<1x!tpu.dma_semaphore, #tpu.memory_space<semaphore_mem>>
      %64 = tpu.memref_squeeze %63 : memref<1x!tpu.dma_semaphore, #tpu.memory_space<semaphore_mem>> -> memref<!tpu.dma_semaphore, #tpu.memory_space<semaphore_mem>>
      tpu.enqueue_dma source(%61 : memref<1x128xf32, #tpu.memory_space<any>>) target(%62 : memref<1x128xf32, #tpu.memory_space<vmem>>) target_semaphore(%64 : memref<!tpu.dma_semaphore, #tpu.memory_space<semaphore_mem>>)
      %c0_i32_43 = arith.constant 0 : i32
      %c0_i32_44 = arith.constant 0 : i32
      %65 = tpu.memref_slice %arg3[%25, %c0_i32_44] : memref<16x128xf32, #tpu.memory_space<any>> -> memref<1x128xf32, #tpu.memory_space<any>>
      %c0_i32_45 = arith.constant 0 : i32
      %c0_i32_46 = arith.constant 0 : i32
      %66 = tpu.memref_slice %arg8[%c0_i32_45, %c0_i32_46] : memref<8x128xf32, #tpu.memory_space<vmem>> -> memref<1x128xf32, #tpu.memory_space<vmem>>
      %67 = tpu.memref_slice %arg10[%c0_i32_43] : memref<8x!tpu.dma_semaphore, #tpu.memory_space<semaphore_mem>> -> memref<1x!tpu.dma_semaphore, #tpu.memory_space<semaphore_mem>>
      %68 = tpu.memref_squeeze %67 : memref<1x!tpu.dma_semaphore, #tpu.memory_space<semaphore_mem>> -> memref<!tpu.dma_semaphore, #tpu.memory_space<semaphore_mem>>
      tpu.wait_dma2 semaphore(%68 : memref<!tpu.dma_semaphore, #tpu.memory_space<semaphore_mem>>) src(%65 : memref<1x128xf32, #tpu.memory_space<any>>) dst(%66 : memref<1x128xf32, #tpu.memory_space<vmem>>)
      %c1_i32_47 = arith.constant 1 : i32
      %c0_i32_48 = arith.constant 0 : i32
      %69 = tpu.memref_slice %arg3[%30, %c0_i32_48] : memref<16x128xf32, #tpu.memory_space<any>> -> memref<1x128xf32, #tpu.memory_space<any>>
      %c1_i32_49 = arith.constant 1 : i32
      %c0_i32_50 = arith.constant 0 : i32
      %70 = tpu.memref_slice %arg8[%c1_i32_49, %c0_i32_50] : memref<8x128xf32, #tpu.memory_space<vmem>> -> memref<1x128xf32, #tpu.memory_space<vmem>>
      %71 = tpu.memref_slice %arg10[%c1_i32_47] : memref<8x!tpu.dma_semaphore, #tpu.memory_space<semaphore_mem>> -> memref<1x!tpu.dma_semaphore, #tpu.memory_space<semaphore_mem>>
      %72 = tpu.memref_squeeze %71 : memref<1x!tpu.dma_semaphore, #tpu.memory_space<semaphore_mem>> -> memref<!tpu.dma_semaphore, #tpu.memory_space<semaphore_mem>>
      tpu.wait_dma2 semaphore(%72 : memref<!tpu.dma_semaphore, #tpu.memory_space<semaphore_mem>>) src(%69 : memref<1x128xf32, #tpu.memory_space<any>>) dst(%70 : memref<1x128xf32, #tpu.memory_space<vmem>>)
      %c2_i32_51 = arith.constant 2 : i32
      %c0_i32_52 = arith.constant 0 : i32
      %73 = tpu.memref_slice %arg3[%35, %c0_i32_52] : memref<16x128xf32, #tpu.memory_space<any>> -> memref<1x128xf32, #tpu.memory_space<any>>
      %c2_i32_53 = arith.constant 2 : i32
      %c0_i32_54 = arith.constant 0 : i32
      %74 = tpu.memref_slice %arg8[%c2_i32_53, %c0_i32_54] : memref<8x128xf32, #tpu.memory_space<vmem>> -> memref<1x128xf32, #tpu.memory_space<vmem>>
      %75 = tpu.memref_slice %arg10[%c2_i32_51] : memref<8x!tpu.dma_semaphore, #tpu.memory_space<semaphore_mem>> -> memref<1x!tpu.dma_semaphore, #tpu.memory_space<semaphore_mem>>
      %76 = tpu.memref_squeeze %75 : memref<1x!tpu.dma_semaphore, #tpu.memory_space<semaphore_mem>> -> memref<!tpu.dma_semaphore, #tpu.memory_space<semaphore_mem>>
      tpu.wait_dma2 semaphore(%76 : memref<!tpu.dma_semaphore, #tpu.memory_space<semaphore_mem>>) src(%73 : memref<1x128xf32, #tpu.memory_space<any>>) dst(%74 : memref<1x128xf32, #tpu.memory_space<vmem>>)
      %c3_i32_55 = arith.constant 3 : i32
      %c0_i32_56 = arith.constant 0 : i32
      %77 = tpu.memref_slice %arg3[%40, %c0_i32_56] : memref<16x128xf32, #tpu.memory_space<any>> -> memref<1x128xf32, #tpu.memory_space<any>>
      %c3_i32_57 = arith.constant 3 : i32
      %c0_i32_58 = arith.constant 0 : i32
      %78 = tpu.memref_slice %arg8[%c3_i32_57, %c0_i32_58] : memref<8x128xf32, #tpu.memory_space<vmem>> -> memref<1x128xf32, #tpu.memory_space<vmem>>
      %79 = tpu.memref_slice %arg10[%c3_i32_55] : memref<8x!tpu.dma_semaphore, #tpu.memory_space<semaphore_mem>> -> memref<1x!tpu.dma_semaphore, #tpu.memory_space<semaphore_mem>>
      %80 = tpu.memref_squeeze %79 : memref<1x!tpu.dma_semaphore, #tpu.memory_space<semaphore_mem>> -> memref<!tpu.dma_semaphore, #tpu.memory_space<semaphore_mem>>
      tpu.wait_dma2 semaphore(%80 : memref<!tpu.dma_semaphore, #tpu.memory_space<semaphore_mem>>) src(%77 : memref<1x128xf32, #tpu.memory_space<any>>) dst(%78 : memref<1x128xf32, #tpu.memory_space<vmem>>)
      %c4_i32_59 = arith.constant 4 : i32
      %c0_i32_60 = arith.constant 0 : i32
      %81 = tpu.memref_slice %arg3[%45, %c0_i32_60] : memref<16x128xf32, #tpu.memory_space<any>> -> memref<1x128xf32, #tpu.memory_space<any>>
      %c4_i32_61 = arith.constant 4 : i32
      %c0_i32_62 = arith.constant 0 : i32
      %82 = tpu.memref_slice %arg8[%c4_i32_61, %c0_i32_62] : memref<8x128xf32, #tpu.memory_space<vmem>> -> memref<1x128xf32, #tpu.memory_space<vmem>>
      %83 = tpu.memref_slice %arg10[%c4_i32_59] : memref<8x!tpu.dma_semaphore, #tpu.memory_space<semaphore_mem>> -> memref<1x!tpu.dma_semaphore, #tpu.memory_space<semaphore_mem>>
      %84 = tpu.memref_squeeze %83 : memref<1x!tpu.dma_semaphore, #tpu.memory_space<semaphore_mem>> -> memref<!tpu.dma_semaphore, #tpu.memory_space<semaphore_mem>>
      tpu.wait_dma2 semaphore(%84 : memref<!tpu.dma_semaphore, #tpu.memory_space<semaphore_mem>>) src(%81 : memref<1x128xf32, #tpu.memory_space<any>>) dst(%82 : memref<1x128xf32, #tpu.memory_space<vmem>>)
      %c5_i32_63 = arith.constant 5 : i32
      %c0_i32_64 = arith.constant 0 : i32
      %85 = tpu.memref_slice %arg3[%50, %c0_i32_64] : memref<16x128xf32, #tpu.memory_space<any>> -> memref<1x128xf32, #tpu.memory_space<any>>
      %c5_i32_65 = arith.constant 5 : i32
      %c0_i32_66 = arith.constant 0 : i32
      %86 = tpu.memref_slice %arg8[%c5_i32_65, %c0_i32_66] : memref<8x128xf32, #tpu.memory_space<vmem>> -> memref<1x128xf32, #tpu.memory_space<vmem>>
      %87 = tpu.memref_slice %arg10[%c5_i32_63] : memref<8x!tpu.dma_semaphore, #tpu.memory_space<semaphore_mem>> -> memref<1x!tpu.dma_semaphore, #tpu.memory_space<semaphore_mem>>
      %88 = tpu.memref_squeeze %87 : memref<1x!tpu.dma_semaphore, #tpu.memory_space<semaphore_mem>> -> memref<!tpu.dma_semaphore, #tpu.memory_space<semaphore_mem>>
      tpu.wait_dma2 semaphore(%88 : memref<!tpu.dma_semaphore, #tpu.memory_space<semaphore_mem>>) src(%85 : memref<1x128xf32, #tpu.memory_space<any>>) dst(%86 : memref<1x128xf32, #tpu.memory_space<vmem>>)
      %c6_i32_67 = arith.constant 6 : i32
      %c0_i32_68 = arith.constant 0 : i32
      %89 = tpu.memref_slice %arg3[%55, %c0_i32_68] : memref<16x128xf32, #tpu.memory_space<any>> -> memref<1x128xf32, #tpu.memory_space<any>>
      %c6_i32_69 = arith.constant 6 : i32
      %c0_i32_70 = arith.constant 0 : i32
      %90 = tpu.memref_slice %arg8[%c6_i32_69, %c0_i32_70] : memref<8x128xf32, #tpu.memory_space<vmem>> -> memref<1x128xf32, #tpu.memory_space<vmem>>
      %91 = tpu.memref_slice %arg10[%c6_i32_67] : memref<8x!tpu.dma_semaphore, #tpu.memory_space<semaphore_mem>> -> memref<1x!tpu.dma_semaphore, #tpu.memory_space<semaphore_mem>>
      %92 = tpu.memref_squeeze %91 : memref<1x!tpu.dma_semaphore, #tpu.memory_space<semaphore_mem>> -> memref<!tpu.dma_semaphore, #tpu.memory_space<semaphore_mem>>
      tpu.wait_dma2 semaphore(%92 : memref<!tpu.dma_semaphore, #tpu.memory_space<semaphore_mem>>) src(%89 : memref<1x128xf32, #tpu.memory_space<any>>) dst(%90 : memref<1x128xf32, #tpu.memory_space<vmem>>)
      %c7_i32_71 = arith.constant 7 : i32
      %c0_i32_72 = arith.constant 0 : i32
      %93 = tpu.memref_slice %arg3[%60, %c0_i32_72] : memref<16x128xf32, #tpu.memory_space<any>> -> memref<1x128xf32, #tpu.memory_space<any>>
      %c7_i32_73 = arith.constant 7 : i32
      %c0_i32_74 = arith.constant 0 : i32
      %94 = tpu.memref_slice %arg8[%c7_i32_73, %c0_i32_74] : memref<8x128xf32, #tpu.memory_space<vmem>> -> memref<1x128xf32, #tpu.memory_space<vmem>>
      %95 = tpu.memref_slice %arg10[%c7_i32_71] : memref<8x!tpu.dma_semaphore, #tpu.memory_space<semaphore_mem>> -> memref<1x!tpu.dma_semaphore, #tpu.memory_space<semaphore_mem>>
      %96 = tpu.memref_squeeze %95 : memref<1x!tpu.dma_semaphore, #tpu.memory_space<semaphore_mem>> -> memref<!tpu.dma_semaphore, #tpu.memory_space<semaphore_mem>>
      tpu.wait_dma2 semaphore(%96 : memref<!tpu.dma_semaphore, #tpu.memory_space<semaphore_mem>>) src(%93 : memref<1x128xf32, #tpu.memory_space<any>>) dst(%94 : memref<1x128xf32, #tpu.memory_space<vmem>>)
      %cst_75 = arith.constant 0.000000e+00 : f32
      %97 = vector.broadcast %cst_75 : f32 to vector<8x128xf32>
      %c0_76 = arith.constant 0 : index
      %c0_77 = arith.constant 0 : index
      %98 = vector.load %arg9[%c0_76, %c0_77] : memref<8x128xf32, #tpu.memory_space<vmem>>, vector<8x128xf32>
      tpu.vector_store %arg9[%c0_76, %c0_77], %97 {strides = array<i32>} : memref<8x128xf32, #tpu.memory_space<vmem>>, vector<8x128xf32>,
    } else {
    }
    %c0 = arith.constant 0 : index
    %c0_1 = arith.constant 0 : index
    %3 = vector.load %arg8[%c0, %c0_1] : memref<8x128xf32, #tpu.memory_space<vmem>>, vector<8x128xf32>
    %4 = arith.truncf %3 : vector<8x128xf32> to vector<8x128xbf16>
    %c0_2 = arith.constant 0 : index
    %c0_3 = arith.constant 0 : index
    %5 = vector.load %arg4[%c0_2, %c0_3] : memref<128x256xbf16, #tpu.memory_space<vmem>>, vector<128x256xbf16>
    %cst = arith.constant dense<0.000000e+00> : vector<8x256xf32>
    %6 = tpu.matmul %4, %5, %cst {dimension_numbers = #tpu.dot_dimension_numbers<[1], [0], [0], [1], [0, 0, 1, 1], [], []>} : vector<8x128xbf16>, vector<128x256xbf16>, vector<8x256xf32> -> vector<8x256xf32>
    %c0_4 = arith.constant 0 : index
    %c0_5 = arith.constant 0 : index
    %7 = vector.load %arg5[%c0_4, %c0_5] : memref<128x256xbf16, #tpu.memory_space<vmem>>, vector<128x256xbf16>
    %cst_6 = arith.constant dense<0.000000e+00> : vector<8x256xf32>
    %8 = tpu.matmul %4, %7, %cst_6 {dimension_numbers = #tpu.dot_dimension_numbers<[1], [0], [0], [1], [0, 0, 1, 1], [], []>} : vector<8x128xbf16>, vector<128x256xbf16>, vector<8x256xf32> -> vector<8x256xf32>
    %9 = arith.negf %6 : vector<8x256xf32>
    %10 = math.exp %9 : vector<8x256xf32>
    %cst_7 = arith.constant 1.000000e+00 : f32
    %11 = vector.broadcast %cst_7 : f32 to vector<8x256xf32>
    %12 = arith.addf %11, %10 : vector<8x256xf32>
    %13 = arith.divf %11, %12 : vector<8x256xf32>
    %14 = arith.mulf %6, %13 : vector<8x256xf32>
    %15 = arith.mulf %14, %8 : vector<8x256xf32>
    %c0_8 = arith.constant 0 : index
    %c0_9 = arith.constant 0 : index
    %16 = vector.load %arg9[%c0_8, %c0_9] : memref<8x128xf32, #tpu.memory_space<vmem>>, vector<8x128xf32>
    %17 = arith.truncf %15 : vector<8x256xf32> to vector<8x256xbf16>
    %c0_10 = arith.constant 0 : index
    %c0_11 = arith.constant 0 : index
    %18 = vector.load %arg6[%c0_10, %c0_11] : memref<256x128xbf16, #tpu.memory_space<vmem>>, vector<256x128xbf16>
    %cst_12 = arith.constant dense<0.000000e+00> : vector<8x128xf32>
    %19 = tpu.matmul %17, %18, %cst_12 {dimension_numbers = #tpu.dot_dimension_numbers<[1], [0], [0], [1], [0, 0, 1, 1], [], []>} : vector<8x256xbf16>, vector<256x128xbf16>, vector<8x128xf32> -> vector<8x128xf32>
    %20 = arith.addf %16, %19 : vector<8x128xf32>
    %c0_13 = arith.constant 0 : index
    %c0_14 = arith.constant 0 : index
    %21 = vector.load %arg9[%c0_13, %c0_14] : memref<8x128xf32, #tpu.memory_space<vmem>>, vector<8x128xf32>
    tpu.vector_store %arg9[%c0_13, %c0_14], %20 {strides = array<i32>} : memref<8x128xf32, #tpu.memory_space<vmem>>, vector<8x128xf32>,
    %c0_i32_15 = arith.constant 0 : i32
    %22 = arith.cmpi eq, %arg0, %c0_i32_15 : i32
    %23 = arith.extui %22 : i1 to i32
    %c0_i32_16 = arith.constant 0 : i32
    %24 = arith.cmpi ne, %23, %c0_i32_16 : i32
    scf.if %24 {
      %c0_17 = arith.constant 0 : index
      %c0_18 = arith.constant 0 : index
      %25 = vector.load %arg9[%c0_17, %c0_18] : memref<8x128xf32, #tpu.memory_space<vmem>>, vector<1x128xf32>
      %26 = vector.shape_cast %25 : vector<1x128xf32> to vector<128xf32>
      %c0_19 = arith.constant 0 : index
      %27 = memref.load %arg2[%c0_19] : memref<8xf32, #tpu.memory_space<smem>>
      %28 = vector.broadcast %27 : f32 to vector<128xf32>
      %29 = arith.mulf %26, %28 : vector<128xf32>
      %c0_20 = arith.constant 0 : index
      %c0_21 = arith.constant 0 : index
      %30 = vector.load %arg7[%c0_20, %c0_21] : memref<8x128xf32, #tpu.memory_space<vmem>>, vector<1x128xf32>
      %31 = vector.shape_cast %30 : vector<1x128xf32> to vector<128xf32>
      %32 = vector.shape_cast %29 : vector<128xf32> to vector<1x128xf32>
      tpu.vector_store %arg7[%c0_20, %c0_21], %32 {strides = array<i32>} : memref<8x128xf32, #tpu.memory_space<vmem>>, vector<1x128xf32>,
      %c1 = arith.constant 1 : index
      %c0_22 = arith.constant 0 : index
      %33 = vector.load %arg9[%c1, %c0_22] : memref<8x128xf32, #tpu.memory_space<vmem>>, vector<1x128xf32>
      %34 = vector.shape_cast %33 : vector<1x128xf32> to vector<128xf32>
      %c1_23 = arith.constant 1 : index
      %35 = memref.load %arg2[%c1_23] : memref<8xf32, #tpu.memory_space<smem>>
      %36 = vector.broadcast %35 : f32 to vector<128xf32>
      %37 = arith.mulf %34, %36 : vector<128xf32>
      %c1_24 = arith.constant 1 : index
      %c0_25 = arith.constant 0 : index
      %38 = vector.load %arg7[%c1_24, %c0_25] : memref<8x128xf32, #tpu.memory_space<vmem>>, vector<1x128xf32>
      %39 = vector.shape_cast %38 : vector<1x128xf32> to vector<128xf32>
      %40 = vector.shape_cast %37 : vector<128xf32> to vector<1x128xf32>
      tpu.vector_store %arg7[%c1_24, %c0_25], %40 {strides = array<i32>} : memref<8x128xf32, #tpu.memory_space<vmem>>, vector<1x128xf32>,
      %c2 = arith.constant 2 : index
      %c0_26 = arith.constant 0 : index
      %41 = vector.load %arg9[%c2, %c0_26] : memref<8x128xf32, #tpu.memory_space<vmem>>, vector<1x128xf32>
      %42 = vector.shape_cast %41 : vector<1x128xf32> to vector<128xf32>
      %c2_27 = arith.constant 2 : index
      %43 = memref.load %arg2[%c2_27] : memref<8xf32, #tpu.memory_space<smem>>
      %44 = vector.broadcast %43 : f32 to vector<128xf32>
      %45 = arith.mulf %42, %44 : vector<128xf32>
      %c2_28 = arith.constant 2 : index
      %c0_29 = arith.constant 0 : index
      %46 = vector.load %arg7[%c2_28, %c0_29] : memref<8x128xf32, #tpu.memory_space<vmem>>, vector<1x128xf32>
      %47 = vector.shape_cast %46 : vector<1x128xf32> to vector<128xf32>
      %48 = vector.shape_cast %45 : vector<128xf32> to vector<1x128xf32>
      tpu.vector_store %arg7[%c2_28, %c0_29], %48 {strides = array<i32>} : memref<8x128xf32, #tpu.memory_space<vmem>>, vector<1x128xf32>,
      %c3 = arith.constant 3 : index
      %c0_30 = arith.constant 0 : index
      %49 = vector.load %arg9[%c3, %c0_30] : memref<8x128xf32, #tpu.memory_space<vmem>>, vector<1x128xf32>
      %50 = vector.shape_cast %49 : vector<1x128xf32> to vector<128xf32>
      %c3_31 = arith.constant 3 : index
      %51 = memref.load %arg2[%c3_31] : memref<8xf32, #tpu.memory_space<smem>>
      %52 = vector.broadcast %51 : f32 to vector<128xf32>
      %53 = arith.mulf %50, %52 : vector<128xf32>
      %c3_32 = arith.constant 3 : index
      %c0_33 = arith.constant 0 : index
      %54 = vector.load %arg7[%c3_32, %c0_33] : memref<8x128xf32, #tpu.memory_space<vmem>>, vector<1x128xf32>
      %55 = vector.shape_cast %54 : vector<1x128xf32> to vector<128xf32>
      %56 = vector.shape_cast %53 : vector<128xf32> to vector<1x128xf32>
      tpu.vector_store %arg7[%c3_32, %c0_33], %56 {strides = array<i32>} : memref<8x128xf32, #tpu.memory_space<vmem>>, vector<1x128xf32>,
      %c4 = arith.constant 4 : index
      %c0_34 = arith.constant 0 : index
      %57 = vector.load %arg9[%c4, %c0_34] : memref<8x128xf32, #tpu.memory_space<vmem>>, vector<1x128xf32>
      %58 = vector.shape_cast %57 : vector<1x128xf32> to vector<128xf32>
      %c4_35 = arith.constant 4 : index
      %59 = memref.load %arg2[%c4_35] : memref<8xf32, #tpu.memory_space<smem>>
      %60 = vector.broadcast %59 : f32 to vector<128xf32>
      %61 = arith.mulf %58, %60 : vector<128xf32>
      %c4_36 = arith.constant 4 : index
      %c0_37 = arith.constant 0 : index
      %62 = vector.load %arg7[%c4_36, %c0_37] : memref<8x128xf32, #tpu.memory_space<vmem>>, vector<1x128xf32>
      %63 = vector.shape_cast %62 : vector<1x128xf32> to vector<128xf32>
      %64 = vector.shape_cast %61 : vector<128xf32> to vector<1x128xf32>
      tpu.vector_store %arg7[%c4_36, %c0_37], %64 {strides = array<i32>} : memref<8x128xf32, #tpu.memory_space<vmem>>, vector<1x128xf32>,
      %c5 = arith.constant 5 : index
      %c0_38 = arith.constant 0 : index
      %65 = vector.load %arg9[%c5, %c0_38] : memref<8x128xf32, #tpu.memory_space<vmem>>, vector<1x128xf32>
      %66 = vector.shape_cast %65 : vector<1x128xf32> to vector<128xf32>
      %c5_39 = arith.constant 5 : index
      %67 = memref.load %arg2[%c5_39] : memref<8xf32, #tpu.memory_space<smem>>
      %68 = vector.broadcast %67 : f32 to vector<128xf32>
      %69 = arith.mulf %66, %68 : vector<128xf32>
      %c5_40 = arith.constant 5 : index
      %c0_41 = arith.constant 0 : index
      %70 = vector.load %arg7[%c5_40, %c0_41] : memref<8x128xf32, #tpu.memory_space<vmem>>, vector<1x128xf32>
      %71 = vector.shape_cast %70 : vector<1x128xf32> to vector<128xf32>
      %72 = vector.shape_cast %69 : vector<128xf32> to vector<1x128xf32>
      tpu.vector_store %arg7[%c5_40, %c0_41], %72 {strides = array<i32>} : memref<8x128xf32, #tpu.memory_space<vmem>>, vector<1x128xf32>,
      %c6 = arith.constant 6 : index
      %c0_42 = arith.constant 0 : index
      %73 = vector.load %arg9[%c6, %c0_42] : memref<8x128xf32, #tpu.memory_space<vmem>>, vector<1x128xf32>
      %74 = vector.shape_cast %73 : vector<1x128xf32> to vector<128xf32>
      %c6_43 = arith.constant 6 : index
      %75 = memref.load %arg2[%c6_43] : memref<8xf32, #tpu.memory_space<smem>>
      %76 = vector.broadcast %75 : f32 to vector<128xf32>
      %77 = arith.mulf %74, %76 : vector<128xf32>
      %c6_44 = arith.constant 6 : index
      %c0_45 = arith.constant 0 : index
      %78 = vector.load %arg7[%c6_44, %c0_45] : memref<8x128xf32, #tpu.memory_space<vmem>>, vector<1x128xf32>
      %79 = vector.shape_cast %78 : vector<1x128xf32> to vector<128xf32>
      %80 = vector.shape_cast %77 : vector<128xf32> to vector<1x128xf32>
      tpu.vector_store %arg7[%c6_44, %c0_45], %80 {strides = array<i32>} : memref<8x128xf32, #tpu.memory_space<vmem>>, vector<1x128xf32>,
      %c7 = arith.constant 7 : index
      %c0_46 = arith.constant 0 : index
      %81 = vector.load %arg9[%c7, %c0_46] : memref<8x128xf32, #tpu.memory_space<vmem>>, vector<1x128xf32>
      %82 = vector.shape_cast %81 : vector<1x128xf32> to vector<128xf32>
      %c7_47 = arith.constant 7 : index
      %83 = memref.load %arg2[%c7_47] : memref<8xf32, #tpu.memory_space<smem>>
      %84 = vector.broadcast %83 : f32 to vector<128xf32>
      %85 = arith.mulf %82, %84 : vector<128xf32>
      %c7_48 = arith.constant 7 : index
      %c0_49 = arith.constant 0 : index
      %86 = vector.load %arg7[%c7_48, %c0_49] : memref<8x128xf32, #tpu.memory_space<vmem>>, vector<1x128xf32>
      %87 = vector.shape_cast %86 : vector<1x128xf32> to vector<128xf32>
      %88 = vector.shape_cast %85 : vector<128xf32> to vector<1x128xf32>
      tpu.vector_store %arg7[%c7_48, %c0_49], %88 {strides = array<i32>} : memref<8x128xf32, #tpu.memory_space<vmem>>, vector<1x128xf32>,
    } else {
    }
    return
  }
  func.func @transform_1(%arg0: i32, %arg1: memref<8xi32, #tpu.memory_space<smem>>, %arg2: memref<8xf32, #tpu.memory_space<smem>>) -> (i32, i32) {
    %c0_i32 = arith.constant 0 : i32
    %c0_i32_0 = arith.constant 0 : i32
    return %c0_i32, %arg0 : i32, i32
  }
  func.func @transform_2(%arg0: i32, %arg1: memref<8xi32, #tpu.memory_space<smem>>, %arg2: memref<8xf32, #tpu.memory_space<smem>>) -> (i32, i32) {
    %c0_i32 = arith.constant 0 : i32
    %c0_i32_0 = arith.constant 0 : i32
    return %c0_i32, %arg0 : i32, i32
  }
  func.func @transform_3(%arg0: i32, %arg1: memref<8xi32, #tpu.memory_space<smem>>, %arg2: memref<8xf32, #tpu.memory_space<smem>>) -> (i32, i32) {
    %c0_i32 = arith.constant 0 : i32
    %c0_i32_0 = arith.constant 0 : i32
    return %arg0, %c0_i32 : i32, i32
  }
  func.func @transform_4(%arg0: i32, %arg1: memref<8xi32, #tpu.memory_space<smem>>, %arg2: memref<8xf32, #tpu.memory_space<smem>>) -> (i32, i32) {
    %c0_i32 = arith.constant 0 : i32
    %c0_i32_0 = arith.constant 0 : i32
    %c0_i32_1 = arith.constant 0 : i32
    return %c0_i32, %c0_i32_0 : i32, i32
  }
}

</mosaic_0001>

<bundles_post_ra>
// kernel: tpu_custom_call.1
= control target key start
LH: loop header
LB: loop body
LE: loop exit
PB: predicated region body
PF: predicated region fallthrough
CT: control target
= control target key end

     0   :  { %s1586_s0 = inlined_call_operand.hbm [shape: s32[8], index: 0, kind: input, shape index: {}]   ;;  %s1587_s2 = inlined_call_operand.hbm [shape: f32[16,128], index: 2, kind: input, shape index: {}]   ;;  %s1588_s3 = inlined_call_operand.hbm [shape: bf16[128,256], index: 3, kind: input, shape index: {}]   ;;  %s1589_s4 = inlined_call_operand.hbm [shape: bf16[128,256], index: 4, kind: input, shape index: {}]   ;;  %s1590_s5 = inlined_call_operand.hbm [shape: bf16[256,128], index: 5, kind: input, shape index: {}]   ;;  %s1591_s6 = inlined_call_operand.hbm [shape: f32[8,128], index: 6, kind: output, shape index: {}]   ;;  %s1592_s1 = inlined_call_operand.vmem [shape: f32[8], index: 1, kind: input, shape index: {}]  }
   0x1   :  { %s1005_s23 = scalar_lea.hbm %s1586_s0, 16 }
   0x2   :  { %p1006_p0 = scmp.ne.s32.totalorder %s1586_s0, %s1005_s23  ;;  %p1009_p1 = scmp.lt.u32.totalorder %s1005_s23, %s1586_s0 }
   0x4   :  { %p1011_p2 = pnand %p1009_p1, %p1006_p0 }
   0x6   :  { %1014 = shalt.err (!%p1011_p2)  }
   0x7   :  { %s1331_s28 = smov [#allocation6]   ;;  %s13_s9 = sshll.u32 %s1592_s1, 4  ;;  %s14_s9 = int_to_ptr.vmem [resolvable:$true] %s13_s9 }
   0x8   :  { %12 = dma.hbm_to_smem %s1586_s0, 16, %s1331_s28, [#allocation5] }
   0x9   :  { %s1015_s10 = scalar_lea.vmem %s14_s9, 16  ;;  %p1020_p4 = scmp.lt.s32.totalorder %s14_s9, %s14_s9 }
   0xa   :  { %p1016_p3 = scmp.ne.s32.totalorder %s14_s9, %s1015_s10  ;;  %p1021_p5 = scmp.lt.s32.totalorder %s1015_s10, %s1015_s10 }
   0xc   :  { %p1022_p6 = por %p1021_p5, %p1020_p4 }
   0xe   :  { %p1023_p7 = pnand %p1022_p6, %p1016_p3 }
  0x10   :  { %1026 = shalt.err (!%p1023_p7)  }
  0x11   :  { %s1332_s11 = smov [#allocation7]  }
  0x12   :  { %16 = dma.vmem_to_smem %s14_s9, 16, %s1332_s11, [#allocation5] }
  0x13   :  { %1307 = dma.done.wait [#allocation5], 32 }
  0x14   :  { %1308 = vsyncadd [#allocation5], 4294967264 }
  0x15   :  { %18 = sfence }
  0x16   :  { %19 = vsyncpa [#allocation9], 0 }
  0x17   :  { %20 = vsyncpa [#allocation12], 0 }
  0x18   :  { %21 = vsyncpa [#allocation10], 0  ;;  %s1333_s0 = smov [#allocation11]   ;;  %s1334_s13 = smov [#allocation8]  }
  0x19   :  { %s39_s12 = sshll.u32 %s1333_s0, 4  ;;  %s27_s1 = sshll.u32 %s1334_s13, 4  ;;  %s40_s12 = int_to_ptr.vmem [resolvable:$true] %s39_s12  ;;  %s1400_s1 = int_to_ptr.vmem [resolvable:$true] %s27_s1 }
  0x1a   :  { %s1027_s16 = scalar_lea.hbm %s1589_s4, 2048 }
  0x1b   :  { %p1028_p8 = scmp.ne.s32.totalorder %s1589_s4, %s1027_s16  ;;  %p1031_p9 = scmp.lt.u32.totalorder %s1027_s16, %s1589_s4 }
  0x1d   :  { %p1033_p10 = pnand %p1031_p9, %p1028_p8 }
  0x1f   :  { %1036 = shalt.err (!%p1033_p10)
}
  0x20   :  { %s1037_s21 = scalar_lea.vmem %s40_s12, 2048  ;;  %p1042_p12 = scmp.lt.s32.totalorder %s40_s12, %s40_s12 }
  0x21   :  { %p1038_p11 = scmp.ne.s32.totalorder %s40_s12, %s1037_s21  ;;  %p1043_p13 = scmp.lt.s32.totalorder %s1037_s21, %s1037_s21 }
  0x23   :  { %p1044_p0 = por %p1043_p13, %p1042_p12 }
  0x25   :  { %p1045_p1 = pnand %p1044_p0, %p1038_p11 }
  0x27   :  { %1048 = shalt.err (!%p1045_p1)
}
  0x28   :  { %s1335_s22 = smov 128   ;;  %s1336_s23 = smov 8  }
  0x29   :  { %45 = dma.hbm_to_vmem [thread:$0]  %s1589_s4, 2048, %s40_s12, [#allocation12], %s1335_s22, %s1335_s22, %s1336_s23  }
  0x2a   :  { %s1049_s28 = scalar_lea.hbm %s1588_s3, 2048 }
  0x2b   :  { %p1050_p2 = scmp.ne.s32.totalorder %s1588_s3, %s1049_s28  ;;  %p1053_p3 = scmp.lt.u32.totalorder %s1049_s28, %s1588_s3 }
  0x2d   :  { %p1055_p4 = pnand %p1053_p3, %p1050_p2 }
  0x2f   :  { %1058 = shalt.err (!%p1055_p4)
}
  0x30   :  { %s1059_s9 = scalar_lea.vmem %s1400_s1, 2048  ;;  %p1064_p6 = scmp.lt.s32.totalorder %s1400_s1, %s1400_s1 }
  0x31   :  { %p1060_p5 = scmp.ne.s32.totalorder %s1400_s1, %s1059_s9  ;;  %p1065_p7 = scmp.lt.s32.totalorder %s1059_s9, %s1059_s9 }
  0x33   :  { %p1066_p8 = por %p1065_p7, %p1064_p6 }
  0x35   :  { %p1067_p9 = pnand %p1066_p8, %p1060_p5 }
  0x37   :  { %1070 = shalt.err (!%p1067_p9)
}
  0x38   :  { %33 = dma.hbm_to_vmem [thread:$0]  %s1588_s3, 2048, %s1400_s1, [#allocation9], %s1335_s22, %s1335_s22, %s1336_s23  }
  0x39   :  { %s1337_s11 = smov [#allocation13]   ;;  %s1071_s14 = scalar_lea.hbm %s1590_s5, 2048 }
  0x3a   :  { %s51_s0 = sshll.u32 %s1337_s11, 4  ;;  %p1072_p10 = scmp.ne.s32.totalorder %s1590_s5, %s1071_s14  ;;  %s52_s0 = int_to_ptr.vmem [resolvable:$true] %s51_s0 }
  0x3b   :  { %p1075_p11 = scmp.lt.u32.totalorder %s1071_s14, %s1590_s5 }
  0x3d   :  { %p1077_p12 = pnand %p1075_p11, %p1072_p10 }
  0x3f   :  { %1080 = shalt.err (!%p1077_p12)
}
  0x40   :  { %s1081_s19 = scalar_lea.vmem %s52_s0, 2048  ;;  %p1086_p0 = scmp.lt.s32.totalorder %s52_s0, %s52_s0 }
  0x41   :  { %p1082_p13 = scmp.ne.s32.totalorder %s52_s0, %s1081_s19  ;;  %p1087_p1 = scmp.lt.s32.totalorder %s1081_s19, %s1081_s19 }
  0x43   :  { %p1088_p2 = por %p1087_p1, %p1086_p0 }
  0x45   :  { %p1089_p3 = pnand %p1088_p2, %p1082_p13 }
  0x47   :  { %1092 = shalt.err (!%p1089_p3)
}
  0x48   :  { %s1338_s3 = smov 64   ;;  %s1339_s1 = smov 4  }
  0x49   :  { %57 = dma.hbm_to_vmem [thread:$0]  %s1590_s5, 2048, %s52_s0, [#allocation12], %s1338_s3, %s1338_s3, %s1339_s1  }
  0x4a   :  { %1309 = dma.done.wait [#allocation9], 2048  }
  0x4b   :  { %1310 = vsyncadd [#allocation9], 4294965248 }
  0x4c   :  { %1311 = dma.done.wait [#allocation12], 4096  }
  0x4d   :  { %1312 = vsyncadd [#allocation12], 4294963200  ;;  %s72_s22 = sld [smem:[#allocation6]]  ;;  %s1340_s23 = smov [#allocation2]  }
  0x4e   :  { %s82_s24 = sshll.u32 %s1340_s23, 4  ;;  %s1445_s25 = sld [smem:[#allocation6 + $0x1]]  ;;  %s1443_s24 = int_to_ptr.vmem [resolvable:$true] %s82_s24 }
  0x4f   :  { %s1341_s26 = smov [#allocation2 + $0x1]   ;;  %s1447_s28 = sld [smem:[#allocation6 + $0x2]] }
  0x50   :  { %s98_s27 = sshll.u32 %s1341_s26, 4  ;;  %s1342_s29 = smov [#allocation2 + $0x2]   ;;  %s1449_s27 = int_to_ptr.vmem [resolvable:$true] %s98_s27 }
  0x51   :  { %s114_s5 = sshll.u32 %s1342_s29, 4  ;;  %s1451_s30 = sld [smem:[#allocation6 + $0x3]]  ;;  %s1453_s5 = int_to_ptr.vmem [resolvable:$true] %s114_s5 }
  0x52   :  { %s1343_s8 = smov [#allocation2 + $0x3]   ;;  %s1464_s15 = scalar_lea.hbm %s1587_s2, 256 }
  0x53   :  { %s811_s7 = sshll.u32 %s72_s22, 4  ;;  %s1455_s9 = sshll.u32 %s1343_s8, 4  ;;  %s131_s9 = int_to_ptr.vmem [resolvable:$true] %s1455_s9 }
  0x54   :  { %s74_s11 = scalar_lea.hbm %s1587_s2, %s811_s7  ;;  %s813_s0 = sshll.u32 %s1445_s25, 4 }
  0x55   :  { %s1093_s12 = scalar_lea.hbm %s74_s11, 16  ;;  %p1096_p5 = scmp.lt.u32.totalorder %s74_s11, %s1587_s2 }
  0x56   :  { %p1094_p4 = scmp.ne.s32.totalorder %s74_s11, %s1093_s12  ;;  %p1097_p6 = scmp.lt.u32.totalorder %s1464_s15, %s1093_s12 }
  0x57   :  { %p1099_p8 = scmp.lt.u32.totalorder %s1093_s12, %s74_s11 }
  0x58   :  { %p1098_p7 = por %p1097_p6, %p1096_p5 }
  0x5a   :  { %p1100_p9 = por %p1099_p8, %p1098_p7 }
  0x5c   :  { %p1101_p10 = pnand %p1100_p9, %p1094_p4 }
  0x5e   :  { %1104 = shalt.err (!%p1101_p10)  }
  0x5f   :  { %s1105_s18 = scalar_lea.vmem %s1443_s24, 16  ;;  %s1473_s19 = scalar_lea.vmem %s1443_s24, 128 }
  0x60   :  { %p1106_p11 = scmp.ne.s32.totalorder %s1443_s24, %s1105_s18  ;;  %p1110_p12 = scmp.lt.s32.totalorder %s1443_s24, %s1443_s24 }
  0x61   :  { %p1111_p13 = scmp.lt.s32.totalorder %s1473_s19, %s1105_s18 }
  0x63   :  { %p1112_p0 = por %p1111_p13, %p1110_p12 }
  0x65   :  { %p1113_p1 = pnand %p1112_p0, %p1106_p11 }
  0x67   :  { %1116 = shalt.err (!%p1113_p1)  }
  0x68   :  { %85 = dma.hbm_to_vmem [thread:$0]  %s74_s11, 16, %s1443_s24, [#allocation4] }
  0x69   :  { %s88_s20 = scalar_lea.hbm %s1587_s2, %s813_s0  ;;  %s815_s21 = sshll.u32 %s1447_s28, 4 }
  0x6a   :  { %s1117_s22 = scalar_lea.hbm %s88_s20, 16  ;;  %p1120_p3 = scmp.lt.u32.totalorder %s88_s20, %s1587_s2 }
  0x6b   :  { %p1118_p2 = scmp.ne.s32.totalorder %s88_s20, %s1117_s22  ;;  %p1121_p4 = scmp.lt.u32.totalorder %s1464_s15, %s1117_s22 }
  0x6c   :  { %p1123_p6 = scmp.lt.u32.totalorder %s1117_s22, %s88_s20 }
  0x6d   :  { %p1122_p5 = por %p1121_p4, %p1120_p3 }
  0x6f   :  { %p1124_p7 = por %p1123_p6, %p1122_p5 }
  0x71   :  { %p1125_p8 = pnand %p1124_p7, %p1118_p2 }
  0x73   :  { %1128 = shalt.err (!%p1125_p8)  }
  0x74   :  { %s1129_s26 = scalar_lea.vmem %s1449_s27, 16  ;;  %p1134_p10 = scmp.lt.s32.totalorder %s1449_s27, %s1443_s24 }
  0x75   :  { %p1130_p9 = scmp.ne.s32.totalorder %s1449_s27, %s1129_s26  ;;  %p1135_p11 = scmp.lt.s32.totalorder %s1473_s19, %s1129_s26 }
  0x77   :  { %p1136_p12 = por %p1135_p11, %p1134_p10 }
  0x79   :  { %p1137_p13 = pnand %p1136_p12, %p1130_p9 }
  0x7b   :  { %1140 = shalt.err (!%p1137_p13)  }
  0x7c   :  { %101 = dma.hbm_to_vmem [thread:$0]  %s88_s20, 16, %s1449_s27, [#allocation4 + $0x1] }
  0x7d   :  { %s104_s7 = scalar_lea.hbm %s1587_s2, %s815_s21  ;;  %s817_s8 = sshll.u32 %s1451_s30, 4 }
  0x7e   :  { %s1141_s4 = scalar_lea.hbm %s104_s7, 16  ;;  %p1144_p1 = scmp.lt.u32.totalorder %s104_s7, %s1587_s2 }
  0x7f   :  { %p1142_p0 = scmp.ne.s32.totalorder %s104_s7, %s1141_s4  ;;  %p1145_p2 = scmp.lt.u32.totalorder %s1464_s15, %s1141_s4 }
  0x80   :  { %p1147_p4 = scmp.lt.u32.totalorder %s1141_s4, %s104_s7 }
  0x81   :  { %p1146_p3 = por %p1145_p2, %p1144_p1 }
  0x83   :  { %p1148_p5 = por %p1147_p4, %p1146_p3 }
  0x85   :  { %p1149_p6 = pnand %p1148_p5, %p1142_p0 }
  0x87   :  { %1152 = shalt.err (!%p1149_p6)  }
  0x88   :  { %s1153_s27 = scalar_lea.vmem %s1453_s5, 16  ;;  %p1158_p8 = scmp.lt.s32.totalorder %s1453_s5, %s1443_s24 }
  0x89   :  { %p1154_p7 = scmp.ne.s32.totalorder %s1453_s5, %s1153_s27  ;;  %p1159_p9 = scmp.lt.s32.totalorder %s1473_s19, %s1153_s27 }
  0x8b   :  { %p1160_p10 = por %p1159_p9, %p1158_p8 }
  0x8d   :  { %p1161_p11 = pnand %p1160_p10, %p1154_p7 }
  0x8f   :  { %1164 = shalt.err (!%p1161_p11)  }
  0x90   :  { %117 = dma.hbm_to_vmem [thread:$0]  %s104_s7, 16, %s1453_s5, [#allocation4 + $0x2] }
  0x91   :  { %s120_s12 = scalar_lea.hbm %s1587_s2, %s817_s8 }
  0x92   :  { %s1165_s13 = scalar_lea.hbm %s120_s12, 16  ;;  %p1168_p13 = scmp.lt.u32.totalorder %s120_s12, %s1587_s2 }
  0x93   :  { %p1166_p12 = scmp.ne.s32.totalorder %s120_s12, %s1165_s13  ;;  %p1169_p0 = scmp.lt.u32.totalorder %s1464_s15, %s1165_s13 }
  0x94   :  { %p1171_p2 = scmp.lt.u32.totalorder %s1165_s13, %s120_s12 }
  0x95   :  { %p1170_p1 = por %p1169_p0, %p1168_p13 }
  0x97   :  { %p1172_p3 = por %p1171_p2, %p1170_p1 }
  0x99   :  { %p1173_p4 = pnand %p1172_p3, %p1166_p12 }
  0x9b   :  { %1176 = shalt.err (!%p1173_p4)  }
  0x9c   :  { %s1177_s17 = scalar_lea.vmem %s131_s9, 16  ;;  %p1182_p6 = scmp.lt.s32.totalorder %s131_s9, %s1443_s24 }
  0x9d   :  { %p1178_p5 = scmp.ne.s32.totalorder %s131_s9, %s1177_s17  ;;  %p1183_p7 = scmp.lt.s32.totalorder %s1473_s19, %s1177_s17 }
  0x9f   :  { %p1184_p8 = por %p1183_p7, %p1182_p6 }
  0xa1   :  { %p1185_p9 = pnand %p1184_p8, %p1178_p5 }
  0xa3   :  { %1188 = shalt.err (!%p1185_p9)  }
  0xa4   :  { %133 = dma.hbm_to_vmem [thread:$0]  %s120_s12, 16, %s131_s9, [#allocation4 + $0x3] }
  0xa5   :  { %s818_s5 = sld [smem:[#allocation6 + $0x4]]  ;;  %s1344_s18 = smov [#allocation2 + $0x4]  }
  0xa6   :  { %s146_s3 = sshll.u32 %s1344_s18, 4  ;;  %s1517_s1 = sld [smem:[#allocation6 + $0x5]]  ;;  %s147_s3 = int_to_ptr.vmem [resolvable:$true] %s146_s3 }
  0xa7   :  { %s1345_s20 = smov [#allocation2 + $0x5]   ;;  %s1519_s22 = sld [smem:[#allocation6 + $0x6]] }
  0xa8   :  { %s162_s21 = sshll.u32 %s1345_s20, 4  ;;  %s1346_s23 = smov [#allocation2 + $0x6]   ;;  %s1521_s21 = int_to_ptr.vmem [resolvable:$true] %s162_s21 }
  0xa9   :  { %s178_s25 = sshll.u32 %s1346_s23, 4  ;;  %s1523_s26 = sld [smem:[#allocation6 + $0x7]]  ;;  %s1525_s25 = int_to_ptr.vmem [resolvable:$true] %s178_s25 }
  0xab   :  { %s819_s28 = sshll.u32 %s818_s5, 4 }
  0xac   :  { %s136_s7 = scalar_lea.hbm %s1587_s2, %s819_s28  ;;  %s821_s8 = sshll.u32 %s1517_s1, 4 }
  0xad   :  { %s1189_s4 = scalar_lea.hbm %s136_s7, 16  ;;  %p1192_p11 = scmp.lt.u32.totalorder %s136_s7, %s1587_s2 }
  0xae   :  { %p1190_p10 = scmp.ne.s32.totalorder %s136_s7, %s1189_s4  ;;  %p1193_p12 = scmp.lt.u32.totalorder %s1464_s15, %s1189_s4 }
  0xaf   :  { %p1195_p0 = scmp.lt.u32.totalorder %s1189_s4, %s136_s7 }
  0xb0   :  { %p1194_p13 = por %p1193_p12, %p1192_p11 }
  0xb2   :  { %p1196_p1 = por %p1195_p0, %p1194_p13 }
  0xb4   :  { %p1197_p2 = pnand %p1196_p1, %p1190_p10 }
  0xb6   :  { %1200 = shalt.err (!%p1197_p2)  }
  0xb7   :  { %s1201_s27 = scalar_lea.vmem %s147_s3, 16  ;;  %p1206_p4 = scmp.lt.s32.totalorder %s147_s3, %s1443_s24 }
  0xb8   :  { %p1202_p3 = scmp.ne.s32.totalorder %s147_s3, %s1201_s27  ;;  %p1207_p5 = scmp.lt.s32.totalorder %s1473_s19, %s1201_s27 }
  0xba   :  { %p1208_p6 = por %p1207_p5, %p1206_p4 }
  0xbc   :  { %p1209_p7 = pnand %p1208_p6, %p1202_p3 }
  0xbe   :  { %1212 = shalt.err (!%p1209_p7)  }
  0xbf   :  { %149 = dma.hbm_to_vmem [thread:$0]  %s136_s7, 16, %s147_s3, [#allocation4 + $0x4] }
  0xc0   :  { %s152_s12 = scalar_lea.hbm %s1587_s2, %s821_s8  ;;  %s823_s13 = sshll.u32 %s1519_s22, 4 }
  0xc1   :  { %s1213_s14 = scalar_lea.hbm %s152_s12, 16  ;;  %p1216_p9 = scmp.lt.u32.totalorder %s152_s12, %s1587_s2 }
  0xc2   :  { %p1214_p8 = scmp.ne.s32.totalorder %s152_s12, %s1213_s14  ;;  %p1217_p10 = scmp.lt.u32.totalorder %s1464_s15, %s1213_s14 }
  0xc3   :  { %p1219_p12 = scmp.lt.u32.totalorder %s1213_s14, %s152_s12 }
  0xc4   :  { %p1218_p11 = por %p1217_p10, %p1216_p9 }
  0xc6   :  { %p1220_p13 = por %p1219_p12, %p1218_p11 }
  0xc8   :  { %p1221_p0 = pnand %p1220_p13, %p1214_p8 }
  0xca   :  { %1224 = shalt.err (!%p1221_p0)  }
  0xcb   :  { %s1225_s5 = scalar_lea.vmem %s1521_s21, 16  ;;  %p1230_p2 = scmp.lt.s32.totalorder %s1521_s21, %s1443_s24 }
  0xcc   :  { %p1226_p1 = scmp.ne.s32.totalorder %s1521_s21, %s1225_s5  ;;  %p1231_p3 = scmp.lt.s32.totalorder %s1473_s19, %s1225_s5 }
  0xce   :  { %p1232_p4 = por %p1231_p3, %p1230_p2 }
  0xd0   :  { %p1233_p5 = pnand %p1232_p4, %p1226_p1 }
  0xd2   :  { %1236 = shalt.err (!%p1233_p5)  }
  0xd3   :  { %165 = dma.hbm_to_vmem [thread:$0]  %s152_s12, 16, %s1521_s21, [#allocation4 + $0x5] }
  0xd4   :  { %s168_s1 = scalar_lea.hbm %s1587_s2, %s823_s13  ;;  %s825_s20 = sshll.u32 %s1523_s26, 4 }
  0xd5   :  { %s1237_s22 = scalar_lea.hbm %s168_s1, 16  ;;  %p1240_p7 = scmp.lt.u32.totalorder %s168_s1, %s1587_s2 }
  0xd6   :  { %p1238_p6 = scmp.ne.s32.totalorder %s168_s1, %s1237_s22  ;;  %p1241_p8 = scmp.lt.u32.totalorder %s1464_s15, %s1237_s22 }
  0xd7   :  { %p1243_p10 = scmp.lt.u32.totalorder %s1237_s22, %s168_s1 }
  0xd8   :  { %p1242_p9 = por %p1241_p8, %p1240_p7 }
  0xda   :  { %p1244_p11 = por %p1243_p10, %p1242_p9 }
  0xdc   :  { %p1245_p12 = pnand %p1244_p11, %p1238_p6 }
  0xde   :  { %1248 = shalt.err (!%p1245_p12)  }
  0xdf   :  { %s1249_s21 = scalar_lea.vmem %s1525_s25, 16  ;;  %p1254_p0 = scmp.lt.s32.totalorder %s1525_s25, %s1443_s24 }
  0xe0   :  { %p1250_p13 = scmp.ne.s32.totalorder %s1525_s25, %s1249_s21  ;;  %p1255_p1 = scmp.lt.s32.totalorder %s1473_s19, %s1249_s21 }
  0xe2   :  { %p1256_p2 = por %p1255_p1, %p1254_p0 }
  0xe4   :  { %p1257_p3 = pnand %p1256_p2, %p1250_p13 }
  0xe6   :  { %1260 = shalt.err (!%p1257_p3)  }
  0xe7   :  { %181 = dma.hbm_to_vmem [thread:$0]  %s168_s1, 16, %s1525_s25, [#allocation4 + $0x6] }
  0xe8   :  { %s184_s29 = scalar_lea.hbm %s1587_s2, %s825_s20  ;;  %s1347_s7 = smov [#allocation2 + $0x7]  }
  0xe9   :  { %s194_s8 = sshll.u32 %s1347_s7, 4  ;;  %s1261_s4 = scalar_lea.hbm %s184_s29, 16  ;;  %s195_s8 = int_to_ptr.vmem [resolvable:$true] %s194_s8 }
  0xea   :  { %p1262_p4 = scmp.ne.s32.totalorder %s184_s29, %s1261_s4  ;;  %p1264_p5 = scmp.lt.u32.totalorder %s184_s29, %s1587_s2 }
  0xeb   :  { %p1265_p6 = scmp.lt.u32.totalorder %s1464_s15, %s1261_s4  ;;  %p1267_p8 = scmp.lt.u32.totalorder %s1261_s4, %s184_s29 }
  0xed   :  { %p1266_p7 = por %p1265_p6, %p1264_p5 }
  0xef   :  { %p1268_p9 = por %p1267_p8, %p1266_p7 }
  0xf1   :  { %p1269_p10 = pnand %p1268_p9, %p1262_p4 }
  0xf3   :  { %1272 = shalt.err (!%p1269_p10)  }
  0xf4   :  { %s1273_s25 = scalar_lea.vmem %s195_s8, 16  ;;  %p1278_p12 = scmp.lt.s32.totalorder %s195_s8, %s1443_s24 }
  0xf5   :  { %p1274_p11 = scmp.ne.s32.totalorder %s195_s8, %s1273_s25  ;;  %p1279_p13 = scmp.lt.s32.totalorder %s1473_s19, %s1273_s25 }
  0xf7   :  { %p1280_p0 = por %p1279_p13, %p1278_p12 }
  0xf9   :  { %p1281_p1 = pnand %p1280_p0, %p1274_p11 }
  0xfb   :  { %1284 = shalt.err (!%p1281_p1)  }
  0xfc   :  { %197 = dma.hbm_to_vmem [thread:$0]  %s184_s29, 16, %s195_s8, [#allocation4 + $0x7] }
  0xfd   :  { %1313 = dma.done.wait [#allocation4], 16 }
  0xfe   :  { %1314 = vsyncadd [#allocation4], 4294967280 }
  0xff   :  { %1315 = dma.done.wait [#allocation4 + $0x1], 16 }
 0x100   :  { %1316 = vsyncadd [#allocation4 + $0x1], 4294967280 }
 0x101   :  { %1317 = dma.done.wait [#allocation4 + $0x2], 16 }
 0x102   :  { %1318 = vsyncadd [#allocation4 + $0x2], 4294967280 }
 0x103   :  { %1319 = dma.done.wait [#allocation4 + $0x3], 16 }
 0x104   :  { %1320 = vsyncadd [#allocation4 + $0x3], 4294967280 }
 0x105   :  { %1321 = dma.done.wait [#allocation4 + $0x4], 16 }
 0x106   :  { %1322 = vsyncadd [#allocation4 + $0x4], 4294967280 }
 0x107   :  { %1323 = dma.done.wait [#allocation4 + $0x5], 16 }
 0x108   :  { %1324 = vsyncadd [#allocation4 + $0x5], 4294967280 }
 0x109   :  { %1325 = dma.done.wait [#allocation4 + $0x6], 16 }
 0x10a   :  { %1326 = vsyncadd [#allocation4 + $0x6], 4294967280 }
 0x10b   :  { %1327 = dma.done.wait [#allocation4 + $0x7], 16 }
 0x10c   :  { %1328 = vsyncadd [#allocation4 + $0x7], 4294967280  ;;  %v1348_v0 = vmov 0   ;;  %v933_v1 = vld [vmem:[#allocation8 + $0x4] ss:$8 sps:$4 sm:$0xff]   ;;  %v216_v28 = vld [vmem:[#allocation2] sm:$0xff] }
 0x10d   :  { %346 = vmatprep.mubr.bf16.mxu0 %v1348_v0  ;;  %483 = vmatprep.mubr.bf16.mxu1 %v1348_v0  ;;  %v935_v2 = vld [vmem:[#allocation8] ss:$8 sps:$4 sm:$0xff]   ;;  %v936_v3 = vld [vmem:[#allocation8 + $0x14] ss:$8 sps:$4 sm:$0xff]   ;;  %v938_v4 = vld [vmem:[#allocation8 + $0x10] ss:$8 sps:$4 sm:$0xff]   ;;  %v217_v31 = vpack.c.bf16 %v216_v28, %v216_v28 }
 0x10e   :  { %314 = vmatprep.subr.bf16.mxu0 %v933_v1  ;;  %v939_v5 = vld [vmem:[#allocation8 + $0x24] ss:$8 sps:$4 sm:$0xff]   ;;  %v941_v6 = vld [vmem:[#allocation8 + $0x20] ss:$8 sps:$4 sm:$0xff]   ;;  %v942_v7 = vld [vmem:[#allocation8 + $0x34] ss:$8 sps:$4 sm:$0xff]  }
 0x10f   :  { %315 = vmatpush1.bf16.msra.mxu0 %v935_v2  ;;  %v954_v8 = vld [vmem:[#allocation11 + $0x4] ss:$8 sps:$4 sm:$0xff]   ;;  %v956_v9 = vld [vmem:[#allocation11] ss:$8 sps:$4 sm:$0xff]   ;;  %v944_v10 = vld [vmem:[#allocation8 + $0x30] ss:$8 sps:$4 sm:$0xff]  }
 0x110   :  { %316 = vmatprep.subr.bf16.mxu0 %v936_v3  ;;  %v945_v11 = vld [vmem:[#allocation8 + $0x44] ss:$8 sps:$4 sm:$0xff]   ;;  %451 = vmatprep.subr.bf16.mxu1 %v954_v8  ;;  %v960_v12 = vld [vmem:[#allocation11 + $0x14] ss:$8 sps:$4 sm:$0xff]   ;;  %v962_v13 = vld [vmem:[#allocation11 + $0x10] ss:$8 sps:$4 sm:$0xff]  }
 0x111   :  { %452 = vmatpush1.bf16.msra.mxu1 %v956_v9  ;;  %v963_v14 = vld [vmem:[#allocation11 + $0x24] ss:$8 sps:$4 sm:$0xff]   ;;  %v947_v15 = vld [vmem:[#allocation8 + $0x40] ss:$8 sps:$4 sm:$0xff]   ;;  %v948_v16 = vld [vmem:[#allocation8 + $0x54] ss:$8 sps:$4 sm:$0xff]  }
 0x112   :  { %453 = vmatprep.subr.bf16.mxu1 %v960_v12  ;;  %v965_v17 = vld [vmem:[#allocation11 + $0x20] ss:$8 sps:$4 sm:$0xff]   ;;  %v966_v18 = vld [vmem:[#allocation11 + $0x34] ss:$8 sps:$4 sm:$0xff]   ;;  %v950_v19 = vld [vmem:[#allocation8 + $0x50] ss:$8 sps:$4 sm:$0xff]  }
 0x113   :  { %317 = vmatpush1.bf16.msra.mxu0 %v938_v4  ;;  %v951_v20 = vld [vmem:[#allocation8 + $0x64] ss:$8 sps:$4 sm:$0xff]   ;;  %v953_v21 = vld [vmem:[#allocation8 + $0x60] ss:$8 sps:$4 sm:$0xff]   ;;  %v968_v22 = vld [vmem:[#allocation11 + $0x30] ss:$8 sps:$4 sm:$0xff]  }
 0x114   :  { %318 = vmatprep.subr.bf16.mxu0 %v939_v5  ;;  %v969_v23 = vld [vmem:[#allocation11 + $0x44] ss:$8 sps:$4 sm:$0xff]   ;;  %v957_v24 = vld [vmem:[#allocation8 + $0x74] ss:$8 sps:$4 sm:$0xff]   ;;  %v971_v25 = vld [vmem:[#allocation11 + $0x40] ss:$8 sps:$4 sm:$0xff]  }
 0x115   :  { %454 = vmatpush1.bf16.msra.mxu1 %v962_v13  ;;  %v972_v26 = vld [vmem:[#allocation11 + $0x54] ss:$8 sps:$4 sm:$0xff]   ;;  %v959_v27 = vld [vmem:[#allocation8 + $0x70] ss:$8 sps:$4 sm:$0xff]   ;;  %v975_v30 = vld [vmem:[#allocation11 + $0x64] ss:$8 sps:$4 sm:$0xff]  }
 0x116   :  { %455 = vmatprep.subr.bf16.mxu1 %v963_v14  ;;  %v974_v29 = vld [vmem:[#allocation11 + $0x50] ss:$8 sps:$4 sm:$0xff]   ;;  %v977_v32 = vld [vmem:[#allocation11 + $0x60] ss:$8 sps:$4 sm:$0xff]   ;;  %v978_v33 = vld [vmem:[#allocation11 + $0x74] ss:$8 sps:$4 sm:$0xff]  }
 0x117   :  { %319 = vmatpush1.bf16.msra.mxu0 %v941_v6  ;;  %v980_v34 = vld [vmem:[#allocation11 + $0x70] ss:$8 sps:$4 sm:$0xff]   ;;  %v981_v35 = vld [vmem:[#allocation13 + $0x40] sm:$0xff]   ;;  %v983_v37 = vld [vmem:[#allocation13 + $0x48] sm:$0xff]   ;;  %s685_s2 = sld [smem:[#allocation7]]  ;;  %s876_s24 = sld [smem:[#allocation7 + $0x1]] }
 0x118   :  { %320 = vmatprep.subr.bf16.mxu0 %v942_v7  ;;  %v982_v36 = vld [vmem:[#allocation13] sm:$0xff]   ;;  %v984_v38 = vld [vmem:[#allocation13 + $0x8] sm:$0xff]   ;;  %v985_v39 = vld [vmem:[#allocation13 + $0x50] sm:$0xff]   ;;  %s877_s15 = sld [smem:[#allocation7 + $0x2]]  ;;  %s878_s19 = sld [smem:[#allocation7 + $0x3]] }
 0x119   :  { %456 = vmatpush1.bf16.msra.mxu1 %v965_v17  ;;  %v986_v40 = vld [vmem:[#allocation13 + $0x10] sm:$0xff]   ;;  %v987_v41 = vld [vmem:[#allocation13 + $0x58] sm:$0xff]   ;;  %v989_v43 = vld [vmem:[#allocation13 + $0x60] sm:$0xff]   ;;  %s879_s27 = sld [smem:[#allocation7 + $0x4]]  ;;  %s880_s30 = sld [smem:[#allocation7 + $0x5]] }
 0x11a   :  { %457 = vmatprep.subr.bf16.mxu1 %v966_v18  ;;  %v988_v42 = vld [vmem:[#allocation13 + $0x18] sm:$0xff]   ;;  %v990_v44 = vld [vmem:[#allocation13 + $0x20] sm:$0xff]   ;;  %v991_v45 = vld [vmem:[#allocation13 + $0x68] sm:$0xff]   ;;  %s881_s0 = sld [smem:[#allocation7 + $0x6]]  ;;  %s882_s12 = sld [smem:[#allocation7 + $0x7]] }
 0x11b   :  { %321 = vmatpush1.bf16.msra.mxu0 %v944_v10  ;;  %v992_v46 = vld [vmem:[#allocation13 + $0x28] sm:$0xff]   ;;  %v993_v47 = vld [vmem:[#allocation13 + $0x70] sm:$0xff]   ;;  %v995_v49 = vld [vmem:[#allocation13 + $0x78] sm:$0xff]   ;;  %s1349_s13 = smov [#allocation14]  }
 0x11c   :  { %322 = vmatprep.subr.bf16.mxu0 %v945_v11  ;;  %v994_v48 = vld [vmem:[#allocation13 + $0x30] sm:$0xff]   ;;  %v996_v50 = vld [vmem:[#allocation13 + $0x38] sm:$0xff]   ;;  %s730_s14 = sshll.u32 %s1349_s13, 4  ;;  %s731_s14 = int_to_ptr.vmem [resolvable:$true] %s730_s14 }
 0x11d   :  { %458 = vmatpush1.bf16.msra.mxu1 %v968_v22  ;;  %v686_v14 = vstv %s685_s2  ;;  %s1285_s16 = scalar_lea.vmem %s731_s14, 128  ;;  %p1290_p3 = scmp.lt.s32.totalorder %s731_s14, %s731_s14 }
 0x11e   :  { %459 = vmatprep.subr.bf16.mxu1 %v969_v23  ;;  %v701_v17 = vstv %s878_s19  ;;  %p1286_p2 = scmp.ne.s32.totalorder %s731_s14, %s1285_s16  ;;  %p1291_p4 = scmp.lt.s32.totalorder %s1285_s16, %s1285_s16 }
 0x11f   :  { %323 = vmatpush1.bf16.msra.mxu0 %v947_v15  ;;  %v691_v15 = vstv %s876_s24  ;;  %v706_v18 = vstv %s879_s27 }
 0x120   :  { %324 = vmatprep.subr.bf16.mxu0 %v948_v16  ;;  %v696_v16 = vstv %s877_s15  ;;  %v716_v23 = vstv %s881_s0  ;;  %p1292_p5 = por %p1291_p4, %p1290_p3 }
 0x121   :  { %460 = vmatpush1.bf16.msra.mxu1 %v971_v25 }
 0x122   :  { %461 = vmatprep.subr.bf16.mxu1 %v972_v26  ;;  %p1293_p6 = pnand %p1292_p5, %p1286_p2 }
 0x123   :  { %325 = vmatpush1.bf16.msra.mxu0 %v950_v19  ;;  %v711_v19 = vstv %s880_s30 }
 0x124   :  { %326 = vmatprep.subr.bf16.mxu0 %v951_v20 }
 0x125   :  { %462 = vmatpush1.bf16.msra.mxu1 %v974_v29 }
 0x126   :  { %463 = vmatprep.subr.bf16.mxu1 %v975_v30 }
 0x127   :  { %327 = vmatpush1.bf16.msra.mxu0 %v953_v21 }
 0x128   :  { %328 = vmatprep.subr.bf16.mxu0 %v957_v24  ;;  %v721_v24 = vstv %s882_s12 }
 0x129   :  { %464 = vmatpush1.bf16.msra.mxu1 %v977_v32 }
 0x12a   :  { %465 = vmatprep.subr.bf16.mxu1 %v978_v33 }
 0x12b   :  { %329 = vmatpush1.bf16.msra.mxu0 %v959_v27 }
 0x12c   :  { %891 = vmatprep.subr.bf16.mxu0 %v981_v35 }
 0x12d   :  { %466 = vmatpush1.bf16.msra.mxu1 %v980_v34 }
 0x12e   :  { %347 = vmatmul.mubr.bf16.vlgmr.msra.gmra.mrb[0].mxu0 %v217_v31 }
 0x12f   :  { %892 = vmatpush3.bf16.msra.mxu0 %v982_v36 }
 0x130   :  { %484 = vmatmul.mubr.bf16.vlgmr.msra.gmra.mrb[0].mxu1 %v217_v31  ;;  %893 = vmatprep.subr.bf16.mxu0 %v983_v37 }
 0x133   :  { %894 = vmatpush3.bf16.msra.mxu0 %v984_v38 }
 0x134   :  { %895 = vmatprep.subr.bf16.mxu0 %v985_v39 }
 0x137   :  { %896 = vmatpush3.bf16.msra.mxu0 %v986_v40 }
 0x138   :  { %897 = vmatprep.subr.bf16.mxu0 %v987_v41 }
 0x13b   :  { %898 = vmatpush3.bf16.msra.mxu0 %v988_v42 }
 0x13c   :  { %899 = vmatprep.subr.bf16.mxu0 %v989_v43 }
 0x13f   :  { %900 = vmatpush3.bf16.msra.mxu0 %v990_v44 }
 0x140   :  { %901 = vmatprep.subr.bf16.mxu0 %v991_v45 }
 0x143   :  { %902 = vmatpush3.bf16.msra.mxu0 %v992_v46 }
 0x144   :  { %903 = vmatprep.subr.bf16.mxu0 %v993_v47 }
 0x147   :  { %904 = vmatpush3.bf16.msra.mxu0 %v994_v48 }
 0x148   :  { %905 = vmatprep.subr.bf16.mxu0 %v995_v49 }
 0x14b   :  { %906 = vmatpush3.bf16.msra.mxu0 %v996_v50 }
 0x201   :  { %v348_v51 = vpop.f32.mrb[0].mxu0 }
 0x202   :  { %v858_v52 = vmul.f32 -1.442695, %v348_v51  ;;  %v350_v53 = vpop.f32.mrb[1].mxu0 }
 0x203   :  { %v859_v54 = vmul.f32 -1.442695, %v350_v53  ;;  %v352_v55 = vpop.f32.mrb[2].mxu0  ;;  %v485_v57 = vpop.f32.mrb[0].mxu1 }
 0x204   :  { %997 = vpow2.f32 %v858_v52  ;;  %v353_v56 = vpop.f32.mrb[3].mxu0  ;;  %v487_v58 = vpop.f32.mrb[1].mxu1 }
 0x205   :  { %999 = vpow2.f32 %v859_v54  ;;  %v489_v59 = vpop.f32.mrb[2].mxu1 }
 0x206   :  { %v490_v61 = vpop.f32.mrb[3].mxu1 }
 0x20e   :  { %v998_v60 = vpop.eup %997 }
 0x20f   :  { %v1000_v62 = vpop.eup %999  ;;  %v498_v63 = vadd.f32 1.0, %v998_v60 }
 0x210   :  { %v499_v0 = vadd.f32 1.0, %v1000_v62 }
 0x211   :  { %1001 = vrcp.f32 %v498_v63 }
 0x212   :  { %1003 = vrcp.f32 %v499_v0 }
 0x21b   :  { %v1002_v1 = vpop.eup %1001 }
 0x21c   :  { %v1004_v2 = vpop.eup %1003  ;;  %v504_v3 = vmul.f32 %v1002_v1, %v348_v51 }
 0x21d   :  { %v505_v4 = vmul.f32 %v1004_v2, %v350_v53 }
 0x21e   :  { %v506_v5 = vmul.f32 %v504_v3, %v485_v57 }
 0x21f   :  { %v507_v6 = vmul.f32 %v505_v4, %v487_v58 }
 0x220   :  { %v509_v8 = vpack.c.bf16 %v506_v5, %v506_v5 }
 0x221   :  { %v510_v7 = vpack.c.bf16 %v507_v6, %v507_v6 }
 0x223   :  { %671 = vmatprep.mubr.bf16.mxu0 %v510_v7 }
 0x224   :  { %672 = vmatmul.mubr.bf16.vlgmr.msra.gmra.mrb[4].mxu0 %v509_v8 }
 0x2f7   :  { %v907_v9 = vpop.f32.mrb[4].mxu0 }
 0x2f8   :  { %v908_v10 = vpop.f32.mrb[5].mxu0 }
 0x2f9   :  { %v909_v11 = vadd.f32 %v908_v10, %v907_v9  ;;  %v910_v12 = vpop.f32.mrb[6].mxu0 }
 0x2fa   :  { %v911_v13 = vpop.f32.mrb[7].mxu0 }
 0x2fb   :  { %680 = vst [vmem:[#allocation3] sm:$0xff] %v909_v11 }
 0x302   :  { %v684_v20 = vld [vmem:[#allocation3] sm:$0x1]  ;;  %v689_v21 = vld [vmem:[#allocation3 + $0x1] sm:$0x1]  ;;  %v694_v22 = vld [vmem:[#allocation3 + $0x2] sm:$0x1] }
 0x303   :  { %v687_v25 = vmul.f32 %v686_v14, %v684_v20  ;;  %v692_v26 = vmul.f32 %v691_v15, %v689_v21  ;;  %v697_v27 = vmul.f32 %v696_v16, %v694_v22  ;;  %v699_v28 = vld [vmem:[#allocation3 + $0x3] sm:$0x1]  ;;  %v704_v29 = vld [vmem:[#allocation3 + $0x4] sm:$0x1]  ;;  %v709_v30 = vld [vmem:[#allocation3 + $0x5] sm:$0x1] }
 0x304   :  { %v702_v31 = vmul.f32 %v701_v17, %v699_v28  ;;  %v707_v32 = vmul.f32 %v706_v18, %v704_v29  ;;  %v712_v33 = vmul.f32 %v711_v19, %v709_v30  ;;  %v714_v34 = vld [vmem:[#allocation3 + $0x6] sm:$0x1]  ;;  %v719_v35 = vld [vmem:[#allocation3 + $0x7] sm:$0x1] }
 0x305   :  { %688 = vst [vmem:[#allocation14] sm:$0x1] %v687_v25  ;;  %693 = vst [vmem:[#allocation14 + $0x1] sm:$0x1] %v692_v26  ;;  %v717_v36 = vmul.f32 %v716_v23, %v714_v34  ;;  %v722_v37 = vmul.f32 %v721_v24, %v719_v35 }
 0x306   :  { %698 = vst [vmem:[#allocation14 + $0x2] sm:$0x1] %v697_v27  ;;  %703 = vst [vmem:[#allocation14 + $0x3] sm:$0x1] %v702_v31 }
 0x307   :  { %708 = vst [vmem:[#allocation14 + $0x4] sm:$0x1] %v707_v32  ;;  %713 = vst [vmem:[#allocation14 + $0x5] sm:$0x1] %v712_v33 }
 0x308   :  { %718 = vst [vmem:[#allocation14 + $0x6] sm:$0x1] %v717_v36  ;;  %723 = vst [vmem:[#allocation14 + $0x7] sm:$0x1] %v722_v37 }
 0x309   :  { %1296 = shalt.err (!%p1293_p6)
}
 0x30a   :  { %s1297_s18 = scalar_lea.hbm %s1591_s6, 128 }
 0x30b   :  { %p1298_p7 = scmp.ne.s32.totalorder %s1591_s6, %s1297_s18  ;;  %p1301_p8 = scmp.lt.u32.totalorder %s1297_s18, %s1591_s6 }
 0x30d   :  { %p1303_p9 = pnand %p1301_p8, %p1298_p7 }
 0x30f   :  { %1306 = shalt.err (!%p1303_p9)
}
 0x310   :  { %733 = dma.vmem_to_hbm [thread:$0]  %s731_s14, 128, %s1591_s6, [#allocation10]  }
 0x311   :  { %1329 = dma.done.wait [#allocation10], 128  }
 0x312   :  { %1330 = vsyncadd [#allocation10], 4294967168 }
 0x313   :  { %737 = vsyncpa [#allocation9], 1 }
 0x314   :  { %738 = vsyncpa [#allocation12], 1 }
 0x315   :  { %739 = vsyncpa [#allocation10], 1 }
 0x316   :  { %740 = vsyncmov [#allocation4] }
 0x319   :  { %s741_s21 = vpop.sfrf %740 }
 0x31a   :  { %p883_p10 = scmp.ne.s32.totalorder %s741_s21, 0 }
 0x31c   :  { %745 = shalt.err (%p883_p10)  }
 0x31d   :  { %747 = vsyncmov [#allocation4 + $0x1] }
 0x320   :  { %s748_s26 = vpop.sfrf %747 }
 0x321   :  { %p884_p11 = scmp.ne.s32.totalorder %s748_s26, 0 }
 0x323   :  { %752 = shalt.err (%p884_p11)  }
 0x324   :  { %754 = vsyncmov [#allocation4 + $0x2] }
 0x327   :  { %s755_s9 = vpop.sfrf %754 }
 0x328   :  { %p885_p12 = scmp.ne.s32.totalorder %s755_s9, 0 }
 0x32a   :  { %759 = shalt.err (%p885_p12)  }
 0x32b   :  { %761 = vsyncmov [#allocation4 + $0x3] }
 0x32e   :  { %s762_s29 = vpop.sfrf %761 }
 0x32f   :  { %p886_p13 = scmp.ne.s32.totalorder %s762_s29, 0 }
 0x331   :  { %766 = shalt.err (%p886_p13)  }
 0x332   :  { %768 = vsyncmov [#allocation4 + $0x4] }
 0x335   :  { %s769_s6 = vpop.sfrf %768 }
 0x336   :  { %p887_p0 = scmp.ne.s32.totalorder %s769_s6, 0 }
 0x338   :  { %773 = shalt.err (%p887_p0)  }
 0x339   :  { %775 = vsyncmov [#allocation4 + $0x5] }
 0x33c   :  { %s776_s7 = vpop.sfrf %775 }
 0x33d   :  { %p888_p1 = scmp.ne.s32.totalorder %s776_s7, 0 }
 0x33f   :  { %780 = shalt.err (%p888_p1)  }
 0x340   :  { %782 = vsyncmov [#allocation4 + $0x6] }
 0x343   :  { %s783_s8 = vpop.sfrf %782 }
 0x344   :  { %p889_p2 = scmp.ne.s32.totalorder %s783_s8, 0 }
 0x346   :  { %787 = shalt.err (%p889_p2)  }
 0x347   :  { %789 = vsyncmov [#allocation4 + $0x7] }
 0x34a   :  { %s790_s4 = vpop.sfrf %789 }
 0x34b   :  { %p890_p3 = scmp.ne.s32.totalorder %s790_s4, 0 }
 0x34d   :  { %794 = shalt.err (%p890_p3)  }

</bundles_post_ra>
